<compile_context>
chip_gen: v7x
topology: tpu7x:2x2x1
jax: 0.10.0
libtpu: 0.0.40
codegen_flags: <defaults>
</compile_context>

<pallas_src>
import functools

import jax
import jax.numpy as jnp
from jax import lax
from jax.experimental import pallas as pl
from jax.experimental.pallas import tpu as pltpu


def _round_up(x: int, m: int) -> int:
    return ((x + m - 1) // m) * m


def sim_softmax_kernel(s_row_ref, s_full_ref, o_ref, *, n_valid: int):
    """Computes one (TM, N_pad) block of softmax(S @ S.T, axis=-1)."""
    s_row = s_row_ref[...]      # (TM, D_pad), native dtype (bf16/f32)
    s_full = s_full_ref[...]    # (N_pad, D_pad), native dtype

    # Contract on the feature dim of BOTH operands: no transposed copy of S.
    sim = lax.dot_general(
        s_row, s_full,
        dimension_numbers=(((1,), (1,)), ((), ())),
        preferred_element_type=jnp.float32,      # f32 accumulation on the MXU
    )                                            # (TM, N_pad) f32

    # Mask out padded columns so they contribute 0 to the softmax.
    if n_valid < sim.shape[-1]:
        col = lax.broadcasted_iota(jnp.int32, sim.shape, 1)
        sim = jnp.where(col < n_valid, sim, jnp.finfo(jnp.float32).min)

    # Numerically stable row softmax (axis=-1 == torch dim=1 for 2-D input).
    m = jnp.max(sim, axis=-1, keepdims=True)
    e = jnp.exp(sim - m)
    denom = jnp.sum(e, axis=-1, keepdims=True)
    inv = pl.reciprocal(denom, approx=True)      # EUP vrcp slot
    o_ref[...] = (e * inv).astype(o_ref.dtype)


def _choose_block_rows(n_pad: int, d_pad: int, in_bytes: int, out_bytes: int,
                       vmem_budget: int = 24 * 1024 * 1024) -> int:
    """Largest row-block (multiple of 128, divides n_pad) fitting the budget.

    Budget accounts for: double-buffered (TM, D) input block, double-buffered
    (TM, N) output block, the VMEM-resident full-S copy (double-buffered by
    the pipeline machinery), and f32 intermediates of the softmax.  24 MiB is
    safely inside the default scoped VMEM limit on v5e/v6e/v7x.
    """
    resident = 2 * n_pad * d_pad * in_bytes
    tm = 128
    candidate = 128
    while candidate <= min(n_pad, 2048):
        if n_pad % candidate == 0:
            per_block = (2 * candidate * d_pad * in_bytes
                         + 2 * candidate * n_pad * out_bytes
                         + 2 * candidate * n_pad * 4)
            if resident + per_block <= vmem_budget:
                tm = candidate
        candidate *= 2
    return min(tm, n_pad)


def mynet_forward(source_variable: jax.Array) -> jax.Array:
    """myNet forward pass: row-softmaxed Gram matrix of the parameter S."""
    n, d = source_variable.shape
    dtype = source_variable.dtype
    n_pad = _round_up(max(n, 1), 128)
    d_pad = _round_up(max(d, 1), 128)

    s = source_variable
    if (n_pad, d_pad) != (n, d):
        s = jnp.pad(s, ((0, n_pad - n), (0, d_pad - d)))

    in_bytes = jnp.dtype(dtype).itemsize
    out_bytes = in_bytes
    tm = _choose_block_rows(n_pad, d_pad, in_bytes, out_bytes)
    grid = (n_pad // tm,)

    cost = pl.CostEstimate(
        flops=2 * n_pad * n_pad * d_pad,
        transcendentals=n_pad * n_pad,
        bytes_accessed=2 * n_pad * d_pad * in_bytes + n_pad * n_pad * out_bytes,
    )

    kernel = functools.partial(sim_softmax_kernel, n_valid=n)

    out_padded = pl.pallas_call(
        kernel,
        out_shape=jax.ShapeDtypeStruct((n_pad, n_pad), dtype),
        grid=grid,
        in_specs=[
            # Row block of S: pipelined / double-buffered across the grid.
            pl.BlockSpec((tm, d_pad), lambda i: (i, 0)),
            # Full S (for the columns of the Gram matrix): constant block
            # index -> stays resident in VMEM across grid steps.
            pl.BlockSpec((n_pad, d_pad), lambda i: (0, 0)),
        ],
        out_specs=pl.BlockSpec((tm, n_pad), lambda i: (i, 0)),
        compiler_params=pltpu.CompilerParams(
            dimension_semantics=("parallel",),   # shard row blocks across TCs
        ),
        cost_estimate=cost,
    )(s, s)

    return out_padded[:n, :n]


def init_source_variable(key, instance_number, encoder_dimension,
                         dtype=jnp.float32):
    """Xavier-uniform init with gain = calculate_gain('relu') = sqrt(2).

    For a 2-D tensor torch uses fan_in = size(1), fan_out = size(0).
    """
    gain = 2.0 ** 0.5
    fan_in = encoder_dimension
    fan_out = instance_number
    bound = gain * (6.0 / (fan_in + fan_out)) ** 0.5
    return jax.random.uniform(
        key, (instance_number, encoder_dimension), dtype=dtype,
        minval=-bound, maxval=bound)


if __name__ == "__main__":
    instance_number = 8      # N
    encoder_dimension = 32   # D

    key = jax.random.PRNGKey(0)
    source_variable = init_source_variable(key, instance_number,
                                           encoder_dimension)

    sim = mynet_forward(source_variable)
    sim = jax.block_until_ready(sim)

    # Reference check against plain JAX.
    ref = jax.nn.softmax(source_variable @ source_variable.T, axis=1)
    assert sim.shape == (instance_number, instance_number)
    assert jnp.allclose(sim, ref, atol=5e-3), "mismatch vs reference softmax"

    # Rows of a softmax sum to 1 (tolerance relaxed for approx reciprocal).
    row_sums = jnp.sum(sim, axis=1)
    assert jnp.allclose(row_sums, jnp.ones_like(row_sums), atol=1e-2)

    print("KERNEL_OK")
</pallas_src>

<mosaic_0001>
module attributes {stable_mosaic.version = 11 : i64} {
  func.func @sim_softmax_kernel(%arg0: i32, %arg1: memref<128x128xf32, #tpu.memory_space<vmem>>, %arg2: memref<128x128xf32, #tpu.memory_space<vmem>>, %arg3: memref<128x128xf32, #tpu.memory_space<vmem>>) attributes {dimension_semantics = [#tpu.dimension_semantics<parallel>], iteration_bounds = array<i64: 1>, scalar_prefetch = 0 : i64, scratch_operands = 0 : i64, tpu.core_type = #tpu.core_type<tc>, window_params = [{transform_indices = @transform_0, window_bounds = array<i64: 128, 128>}, {pipeline_mode = #tpu.pipeline_mode<synchronous>, transform_indices = @transform_1, window_bounds = array<i64: 128, 128>}, {transform_indices = @transform_2, window_bounds = array<i64: 128, 128>}]} {
    %c0 = arith.constant 0 : index
    %c0_0 = arith.constant 0 : index
    %0 = vector.load %arg1[%c0, %c0_0] : memref<128x128xf32, #tpu.memory_space<vmem>>, vector<128x128xf32>
    %c0_1 = arith.constant 0 : index
    %c0_2 = arith.constant 0 : index
    %1 = vector.load %arg2[%c0_1, %c0_2] : memref<128x128xf32, #tpu.memory_space<vmem>>, vector<128x128xf32>
    %cst = arith.constant dense<0.000000e+00> : vector<128x128xf32>
    %2 = tpu.matmul %0, %1, %cst {dimension_numbers = #tpu.dot_dimension_numbers<[1], [1], [0], [0], [0, 0, 1, 0], [], []>} : vector<128x128xf32>, vector<128x128xf32>, vector<128x128xf32> -> vector<128x128xf32>
    %3 = tpu.iota {dimensions = array<i32: 1>} : vector<128x128xi32>
    %c8_i32 = arith.constant 8 : i32
    %4 = vector.broadcast %c8_i32 : i32 to vector<128x128xi32>
    %5 = arith.cmpi slt, %3, %4 : vector<128x128xi32>
    %cst_3 = arith.constant -3.40282347E+38 : f32
    %6 = vector.broadcast %cst_3 : f32 to vector<128x128xf32>
    %7 = arith.select %5, %2, %6 : vector<128x128xi1>, vector<128x128xf32>
    %cst_4 = arith.constant dense<0xFF800000> : vector<128xf32>
    %8 = vector.multi_reduction <maximumf>, %7, %cst_4 [1] : vector<128x128xf32> to vector<128xf32>
    %9 = vector.shape_cast %8 : vector<128xf32> to vector<128x1xf32>
    %10 = vector.broadcast %9 : vector<128x1xf32> to vector<128x128xf32>
    %11 = arith.subf %7, %10 : vector<128x128xf32>
    %12 = math.exp %11 : vector<128x128xf32>
    %cst_5 = arith.constant dense<0.000000e+00> : vector<128xf32>
    %13 = vector.multi_reduction <add>, %12, %cst_5 [1] : vector<128x128xf32> to vector<128xf32>
    %14 = vector.shape_cast %13 : vector<128xf32> to vector<128x1xf32>
    %15 = tpu.reciprocal %14 {approx = true} : vector<128x1xf32> -> vector<128x1xf32>
    %16 = vector.broadcast %15 : vector<128x1xf32> to vector<128x128xf32>
    %17 = arith.mulf %12, %16 : vector<128x128xf32>
    %c0_6 = arith.constant 0 : index
    %c0_7 = arith.constant 0 : index
    %18 = vector.load %arg3[%c0_6, %c0_7] : memref<128x128xf32, #tpu.memory_space<vmem>>, vector<128x128xf32>
    tpu.vector_store %arg3[%c0_6, %c0_7], %17 {strides = array<i32>} : memref<128x128xf32, #tpu.memory_space<vmem>>, vector<128x128xf32>,
    return
  }
  func.func @transform_0(%arg0: i32) -> (i32, i32) {
    %c0_i32 = arith.constant 0 : i32
    %c0_i32_0 = arith.constant 0 : i32
    return %arg0, %c0_i32 : i32, i32
  }
  func.func @transform_1(%arg0: i32) -> (i32, i32) {
    %c0_i32 = arith.constant 0 : i32
    %c0_i32_0 = arith.constant 0 : i32
    %c0_i32_1 = arith.constant 0 : i32
    return %c0_i32, %c0_i32_0 : i32, i32
  }
  func.func @transform_2(%arg0: i32) -> (i32, i32) {
    %c0_i32 = arith.constant 0 : i32
    %c0_i32_0 = arith.constant 0 : i32
    return %arg0, %c0_i32 : i32, i32
  }
}

</mosaic_0001>

<bundles_post_ra>
// kernel: tpu_custom_call.1
= control target key start
LH: loop header
LB: loop body
LE: loop exit
PB: predicated region body
PF: predicated region fallthrough
CT: control target
= control target key end

     0   :  { %7 = vsyncpa [#allocation3], 0  ;;  %s856_s0 = inlined_call_operand.hbm [shape: f32[128,128], index: 0, kind: input, shape index: {}]   ;;  %s857_s1 = inlined_call_operand.hbm [shape: f32[128,128], index: 1, kind: input, shape index: {}]   ;;  %s858_s2 = inlined_call_operand.hbm [shape: f32[128,128], index: 2, kind: output, shape index: {}]  }
   0x1   :  { %8 = vsyncpa [#allocation6], 0 }
   0x2   :  { %9 = vsyncpa [#allocation4], 0  ;;  %s691_s9 = smov [#allocation2]   ;;  %s619_s13 = scalar_lea.hbm %s856_s0, 2048 }
   0x3   :  { %s15_s10 = sshll.u32 %s691_s9, 4  ;;  %p620_p0 = scmp.ne.s32.totalorder %s856_s0, %s619_s13  ;;  %s16_s10 = int_to_ptr.vmem [resolvable:$true] %s15_s10 }
   0x4   :  { %p623_p1 = scmp.lt.u32.totalorder %s619_s13, %s856_s0 }
   0x6   :  { %p625_p2 = pnand %p623_p1, %p620_p0 }
   0x8   :  { %628 = shalt.err (!%p625_p2)
}
   0x9   :  { %s629_s18 = scalar_lea.vmem %s16_s10, 2048  ;;  %p634_p4 = scmp.lt.s32.totalorder %s16_s10, %s16_s10 }
   0xa   :  { %p630_p3 = scmp.ne.s32.totalorder %s16_s10, %s629_s18  ;;  %p635_p5 = scmp.lt.s32.totalorder %s629_s18, %s629_s18 }
   0xc   :  { %p636_p6 = por %p635_p5, %p634_p4 }
   0xe   :  { %p637_p7 = pnand %p636_p6, %p630_p3 }
  0x10   :  { %640 = shalt.err (!%p637_p7)
}
  0x11   :  { %s692_s19 = smov 128   ;;  %s693_s20 = smov 8  }
  0x12   :  { %21 = dma.hbm_to_vmem [thread:$0]  %s856_s0, 2048, %s16_s10, [#allocation3], %s692_s19, %s692_s19, %s693_s20  }
  0x13   :  { %s694_s23 = smov [#allocation5]   ;;  %s641_s27 = scalar_lea.hbm %s857_s1, 2048 }
  0x14   :  { %s27_s24 = sshll.u32 %s694_s23, 4  ;;  %p642_p8 = scmp.ne.s32.totalorder %s857_s1, %s641_s27  ;;  %s28_s24 = int_to_ptr.vmem [resolvable:$true] %s27_s24 }
  0x15   :  { %p645_p9 = scmp.lt.u32.totalorder %s641_s27, %s857_s1 }
  0x17   :  { %p647_p10 = pnand %p645_p9, %p642_p8 }
  0x19   :  { %650 = shalt.err (!%p647_p10)
}
  0x1a   :  { %s651_s4 = scalar_lea.vmem %s28_s24, 2048  ;;  %p656_p12 = scmp.lt.s32.totalorder %s28_s24, %s28_s24 }
  0x1b   :  { %p652_p11 = scmp.ne.s32.totalorder %s28_s24, %s651_s4  ;;  %p657_p13 = scmp.lt.s32.totalorder %s651_s4, %s651_s4 }
  0x1d   :  { %p658_p0 = por %p657_p13, %p656_p12 }
  0x1f   :  { %p659_p1 = pnand %p658_p0, %p652_p11 }
  0x21   :  { %662 = shalt.err (!%p659_p1)
}
  0x22   :  { %33 = dma.hbm_to_vmem [thread:$0]  %s857_s1, 2048, %s28_s24, [#allocation6], %s692_s19, %s692_s19, %s693_s20  }
  0x23   :  { %685 = dma.done.wait [#allocation3], 2048  }
  0x24   :  { %686 = vsyncadd [#allocation3], 4294965248 }
  0x25   :  { %687 = dma.done.wait [#allocation6], 2048  }
  0x26   :  { %688 = vsyncadd [#allocation6], 4294965248  ;;  %v56_v0 = vld [vmem:[#allocation5] sm:$0xff]  ;;  %v57_v1 = vld [vmem:[#allocation5 + $0x8] sm:$0xff]  ;;  %v217_v40 = vlaneseq  ;;  %s695_s1 = smov [#allocation7]  }
  0x27   :  { %v58_v2 = vld [vmem:[#allocation5 + $0x10] sm:$0xff]  ;;  %v502_v3 = vpack.c.bf16 %v57_v1, %v56_v0  ;;  %v59_v4 = vld [vmem:[#allocation5 + $0x18] sm:$0xff]  ;;  %v40_v6 = vld [vmem:[#allocation2] sm:$0xff]  ;;  %s401_s6 = sshll.u32 %s695_s1, 4  ;;  %s402_s6 = int_to_ptr.vmem [resolvable:$true] %s401_s6 }
  0x28   :  { %v506_v5 = vpack.c.bf16 %v59_v4, %v58_v2  ;;  %v48_v7 = vld [vmem:[#allocation2 + $0x40] sm:$0xff]  ;;  %v61_v9 = vld [vmem:[#allocation5 + $0x28] sm:$0xff]  ;;  %478 = vmatprep.mubr.f32.mxu0 %v40_v6  ;;  %v62_v11 = vld [vmem:[#allocation5 + $0x30] sm:$0xff]  ;;  %v218_v41 = vand.u32 127, %v217_v40  ;;  %s663_s7 = scalar_lea.vmem %s402_s6, 2048  ;;  %p668_p3 = scmp.lt.s32.totalorder %s402_s6, %s402_s6 }
  0x29   :  { %503 = vmatprep.subr.bf16.mxu0 %v502_v3  ;;  %534 = vmatprep.subr.bf16.mxu1 %v502_v3  ;;  %v60_v8 = vld [vmem:[#allocation5 + $0x20] sm:$0xff]  ;;  %v63_v12 = vld [vmem:[#allocation5 + $0x38] sm:$0xff]  ;;  %v65_v15 = vld [vmem:[#allocation5 + $0x48] sm:$0xff]  ;;  %p664_p2 = scmp.ne.s32.totalorder %s402_s6, %s663_s7  ;;  %p669_p4 = scmp.lt.s32.totalorder %s663_s7, %s663_s7 }
  0x2a   :  { %505 = vmatpush3.bf16.xpose.msra.mxu0 %v502_v3  ;;  %542 = vmatpush3.bf16.xpose.msra.mxu1 %v502_v3  ;;  %v510_v10 = vpack.c.bf16 %v61_v9, %v60_v8  ;;  %v514_v13 = vpack.c.bf16 %v63_v12, %v62_v11  ;;  %v64_v14 = vld [vmem:[#allocation5 + $0x40] sm:$0xff]  ;;  %v66_v17 = vld [vmem:[#allocation5 + $0x50] sm:$0xff]  ;;  %v67_v18 = vld [vmem:[#allocation5 + $0x58] sm:$0xff]  ;;  %vm219_vm0 = vcmp.lt.s32.totalorder %v218_v41, 8 }
  0x2b   :  { %507 = vmatprep.subr.bf16.mxu0 %v506_v5  ;;  %535 = vmatprep.subr.bf16.mxu1 %v506_v5  ;;  %v518_v16 = vpack.c.bf16 %v65_v15, %v64_v14  ;;  %v522_v19 = vpack.c.bf16 %v67_v18, %v66_v17  ;;  %v68_v20 = vld [vmem:[#allocation5 + $0x60] sm:$0xff]  ;;  %v69_v21 = vld [vmem:[#allocation5 + $0x68] sm:$0xff]  ;;  %v70_v23 = vld [vmem:[#allocation5 + $0x70] sm:$0xff]  ;;  %p670_p5 = por %p669_p4, %p668_p3 }
  0x2c   :  { %490 = vmatprep.mubr.f32.mxu1 %v48_v7  ;;  %v526_v22 = vpack.c.bf16 %v69_v21, %v68_v20  ;;  %v71_v24 = vld [vmem:[#allocation5 + $0x78] sm:$0xff]  ;;  %v41_v26 = vld [vmem:[#allocation2 + $0x8] sm:$0xff]  ;;  %v42_v28 = vld [vmem:[#allocation2 + $0x10] sm:$0xff] }
  0x2d   :  { %v530_v25 = vpack.c.bf16 %v71_v24, %v70_v23  ;;  %v49_v27 = vld [vmem:[#allocation2 + $0x48] sm:$0xff]  ;;  %v50_v29 = vld [vmem:[#allocation2 + $0x50] sm:$0xff]  ;;  %v43_v30 = vld [vmem:[#allocation2 + $0x18] sm:$0xff]  ;;  %p671_p6 = pnand %p670_p5, %p664_p2 }
  0x2e   :  { %v51_v31 = vld [vmem:[#allocation2 + $0x58] sm:$0xff]  ;;  %v44_v32 = vld [vmem:[#allocation2 + $0x20] sm:$0xff]  ;;  %v45_v34 = vld [vmem:[#allocation2 + $0x28] sm:$0xff] }
  0x2f   :  { %v52_v33 = vld [vmem:[#allocation2 + $0x60] sm:$0xff]  ;;  %v53_v35 = vld [vmem:[#allocation2 + $0x68] sm:$0xff]  ;;  %v46_v36 = vld [vmem:[#allocation2 + $0x30] sm:$0xff] }
  0x30   :  { %v54_v37 = vld [vmem:[#allocation2 + $0x70] sm:$0xff]  ;;  %v47_v38 = vld [vmem:[#allocation2 + $0x38] sm:$0xff] }
  0x31   :  { %v55_v39 = vld [vmem:[#allocation2 + $0x78] sm:$0xff] }
  0x32   :  { %509 = vmatpush3.bf16.xpose.msra.mxu0 %v506_v5  ;;  %543 = vmatpush3.bf16.xpose.msra.mxu1 %v506_v5 }
  0x33   :  { %511 = vmatprep.subr.bf16.mxu0 %v510_v10  ;;  %536 = vmatprep.subr.bf16.mxu1 %v510_v10 }
  0x3a   :  { %513 = vmatpush3.bf16.xpose.msra.mxu0 %v510_v10  ;;  %544 = vmatpush3.bf16.xpose.msra.mxu1 %v510_v10 }
  0x3b   :  { %515 = vmatprep.subr.bf16.mxu0 %v514_v13  ;;  %537 = vmatprep.subr.bf16.mxu1 %v514_v13 }
  0x42   :  { %517 = vmatpush3.bf16.xpose.msra.mxu0 %v514_v13  ;;  %545 = vmatpush3.bf16.xpose.msra.mxu1 %v514_v13 }
  0x43   :  { %519 = vmatprep.subr.bf16.mxu0 %v518_v16  ;;  %538 = vmatprep.subr.bf16.mxu1 %v518_v16 }
  0x4a   :  { %521 = vmatpush3.bf16.xpose.msra.mxu0 %v518_v16  ;;  %546 = vmatpush3.bf16.xpose.msra.mxu1 %v518_v16 }
  0x4b   :  { %523 = vmatprep.subr.bf16.mxu0 %v522_v19  ;;  %539 = vmatprep.subr.bf16.mxu1 %v522_v19 }
  0x52   :  { %525 = vmatpush3.bf16.xpose.msra.mxu0 %v522_v19  ;;  %547 = vmatpush3.bf16.xpose.msra.mxu1 %v522_v19 }
  0x53   :  { %527 = vmatprep.subr.bf16.mxu0 %v526_v22  ;;  %540 = vmatprep.subr.bf16.mxu1 %v526_v22 }
  0x5a   :  { %529 = vmatpush3.bf16.xpose.msra.mxu0 %v526_v22  ;;  %548 = vmatpush3.bf16.xpose.msra.mxu1 %v526_v22 }
  0x5b   :  { %531 = vmatprep.subr.bf16.mxu0 %v530_v25  ;;  %541 = vmatprep.subr.bf16.mxu1 %v530_v25 }
  0x62   :  { %533 = vmatpush3.bf16.xpose.msra.mxu0 %v530_v25  ;;  %549 = vmatpush3.bf16.xpose.msra.mxu1 %v530_v25 }
  0x69   :  { %479 = vmatmul.mubr.f32.vlgmr.msra.gmra.mrb[0].mxu0 %v41_v26  ;;  %491 = vmatmul.mubr.f32.vlgmr.msra.gmra.mrb[0].mxu1 %v49_v27 }
  0x6a   :  { %481 = vmatprep.mubr.f32.mxu0 %v42_v28  ;;  %493 = vmatprep.mubr.f32.mxu1 %v50_v29 }
  0x6d   :  { %482 = vmatmul.mubr.f32.gmra.mrb[2].mxu0 %v43_v30  ;;  %494 = vmatmul.mubr.f32.gmra.mrb[2].mxu1 %v51_v31 }
  0x6e   :  { %484 = vmatprep.mubr.f32.mxu0 %v44_v32  ;;  %496 = vmatprep.mubr.f32.mxu1 %v52_v33 }
  0x71   :  { %485 = vmatmul.mubr.f32.gmra.mrb[4].mxu0 %v45_v34  ;;  %497 = vmatmul.mubr.f32.gmra.mrb[4].mxu1 %v53_v35 }
  0x72   :  { %487 = vmatprep.mubr.f32.mxu0 %v46_v36  ;;  %499 = vmatprep.mubr.f32.mxu1 %v54_v37 }
  0x75   :  { %488 = vmatmul.mubr.f32.gmra.mrb[6].mxu0 %v47_v38  ;;  %500 = vmatmul.mubr.f32.gmra.mrb[6].mxu1 %v55_v39 }
 0x13c   :  { %v480_v42 = vpop.f32.mrb[0].mxu0  ;;  %v492_v43 = vpop.f32.mrb[0].mxu1 }
 0x13d   :  { %v138_v44 = vpop.f32.mrb[1].mxu0  ;;  %v178_v45 = vpop.f32.mrb[1].mxu1  ;;  %v229_v46 = vsel %vm219_vm0, %v492_v43, -3.4028235e+38  ;;  %v221_v47 = vsel %vm219_vm0, %v480_v42, -3.4028235e+38 }
 0x13e   :  { %254 = vmax.xlane.f32.xlu1 %v229_v46  ;;  %238 = vmax.xlane.f32.xlu0 %v221_v47  ;;  %v220_v51 = vsel %vm219_vm0, %v138_v44, -3.4028235e+38  ;;  %v228_v57 = vsel %vm219_vm0, %v178_v45, -3.4028235e+38 }
 0x140   :  { %v483_v48 = vpop.f32.mrb[2].mxu0  ;;  %v495_v49 = vpop.f32.mrb[2].mxu1 }
 0x141   :  { %v148_v50 = vpop.f32.mrb[3].mxu0  ;;  %v223_v52 = vsel %vm219_vm0, %v483_v48, -3.4028235e+38  ;;  %v188_v53 = vpop.f32.mrb[3].mxu1  ;;  %v231_v54 = vsel %vm219_vm0, %v495_v49, -3.4028235e+38 }
 0x142   :  { %236 = vmax.xlane.f32.xlu0 %v220_v51  ;;  %242 = vmax.xlane.f32.xlu1 %v223_v52  ;;  %v230_v62 = vsel %vm219_vm0, %v188_v53, -3.4028235e+38  ;;  %v222_v63 = vsel %vm219_vm0, %v148_v50, -3.4028235e+38 }
 0x144   :  { %v486_v55 = vpop.f32.mrb[4].mxu0  ;;  %v498_v56 = vpop.f32.mrb[4].mxu1 }
 0x145   :  { %v158_v58 = vpop.f32.mrb[5].mxu0  ;;  %v198_v59 = vpop.f32.mrb[5].mxu1  ;;  %v225_v2 = vsel %vm219_vm0, %v486_v55, -3.4028235e+38  ;;  %v233_v4 = vsel %vm219_vm0, %v498_v56, -3.4028235e+38 }
 0x146   :  { %252 = vmax.xlane.f32.xlu0 %v228_v57  ;;  %258 = vmax.xlane.f32.xlu1 %v231_v54  ;;  %v224_v3 = vsel %vm219_vm0, %v158_v58, -3.4028235e+38  ;;  %v753_v5 = vsel %vm219_vm0, %v198_v59, -3.4028235e+38 }
 0x148   :  { %v489_v60 = vpop.f32.mrb[6].mxu0  ;;  %v501_v61 = vpop.f32.mrb[6].mxu1 }
 0x149   :  { %v168_v0 = vpop.f32.mrb[7].mxu0  ;;  %v208_v1 = vpop.f32.mrb[7].mxu1  ;;  %v757_v6 = vsel %vm219_vm0, %v489_v60, -3.4028235e+38  ;;  %v765_v8 = vsel %vm219_vm0, %v501_v61, -3.4028235e+38 }
 0x14a   :  { %256 = vmax.xlane.f32.xlu0 %v230_v62  ;;  %240 = vmax.xlane.f32.xlu1 %v222_v63  ;;  %v760_v7 = vsel %vm219_vm0, %v168_v0, -3.4028235e+38  ;;  %v768_v9 = vsel %vm219_vm0, %v208_v1, -3.4028235e+38 }
 0x14e   :  { %246 = vmax.xlane.f32.xlu1 %v225_v2  ;;  %244 = vmax.xlane.f32.xlu0 %v224_v3 }
 0x152   :  { %262 = vmax.xlane.f32.xlu1 %v233_v4  ;;  %260 = vmax.xlane.f32.xlu0 %v753_v5 }
 0x156   :  { %250 = vmax.xlane.f32.xlu1 %v757_v6  ;;  %248 = vmax.xlane.f32.xlu0 %v760_v7 }
 0x15a   :  { %266 = vmax.xlane.f32.xlu1 %v765_v8  ;;  %264 = vmax.xlane.f32.xlu0 %v768_v9 }
 0x1cb   :  { %v255_v10 = vpop.xlane.xlu1 %254  ;;  %v239_v11 = vpop.xlane.xlu0 %238 }
 0x1cc   :  { %v269_v12 = vsub.f32 %v221_v47, %v239_v11  ;;  %v277_v13 = vsub.f32 %v229_v46, %v255_v10 }
 0x1ce   :  { %v286_v14 = vmul.f32 1.442695, %v269_v12  ;;  %v302_v18 = vmul.f32 1.442695, %v277_v13 }
 0x1cf   :  { %v237_v15 = vpop.xlane.xlu0 %236  ;;  %v243_v16 = vpop.xlane.xlu1 %242 }
 0x1d0   :  { %v268_v17 = vsub.f32 %v220_v51, %v237_v15  ;;  %555 = vpow2.f32 %v286_v14  ;;  %v271_v19 = vsub.f32 %v223_v52, %v243_v16 }
 0x1d2   :  { %v284_v20 = vmul.f32 1.442695, %v268_v17  ;;  %v290_v25 = vmul.f32 1.442695, %v271_v19 }
 0x1d3   :  { %v253_v21 = vpop.xlane.xlu0 %252  ;;  %v259_v22 = vpop.xlane.xlu1 %258 }
 0x1d4   :  { %557 = vpow2.f32 %v284_v20  ;;  %v276_v23 = vsub.f32 %v228_v57, %v253_v21  ;;  %v279_v24 = vsub.f32 %v231_v54, %v259_v22 }
 0x1d5   :  { %559 = vpow2.f32 %v302_v18 }
 0x1d6   :  { %v300_v26 = vmul.f32 1.442695, %v276_v23  ;;  %v306_v29 = vmul.f32 1.442695, %v279_v24 }
 0x1d7   :  { %v257_v27 = vpop.xlane.xlu0 %256  ;;  %v241_v28 = vpop.xlane.xlu1 %240 }
 0x1d8   :  { %561 = vpow2.f32 %v300_v26  ;;  %v270_v30 = vsub.f32 %v222_v63, %v241_v28  ;;  %v278_v31 = vsub.f32 %v230_v62, %v257_v27 }
 0x1d9   :  { %563 = vpow2.f32 %v290_v25 }
 0x1da   :  { %v288_v32 = vmul.f32 1.442695, %v270_v30  ;;  %v772_v33 = vpop.eup %555  ;;  %565 = vpow2.f32 %v306_v29  ;;  %v304_v37 = vmul.f32 1.442695, %v278_v31 }
 0x1db   :  { %v247_v34 = vpop.xlane.xlu1 %246  ;;  %v245_v35 = vpop.xlane.xlu0 %244  ;;  %318 = vadd.xlane.f32.xlu1 %v772_v33 }
 0x1dc   :  { %v273_v36 = vsub.f32 %v225_v2, %v247_v34  ;;  %567 = vpow2.f32 %v288_v32  ;;  %v272_v38 = vsub.f32 %v224_v3, %v245_v35 }
 0x1de   :  { %v775_v39 = vpop.eup %557  ;;  %v294_v40 = vmul.f32 1.442695, %v273_v36  ;;  %v292_v45 = vmul.f32 1.442695, %v272_v38 }
 0x1df   :  { %v777_v41 = vpop.eup %559  ;;  %v263_v42 = vpop.xlane.xlu1 %262  ;;  %316 = vadd.xlane.f32.xlu0 %v775_v39 }
 0x1e0   :  { %v261_v43 = vpop.xlane.xlu0 %260  ;;  %569 = vpow2.f32 %v294_v40  ;;  %v281_v44 = vsub.f32 %v233_v4, %v263_v42  ;;  %334 = vadd.xlane.f32.xlu1 %v777_v41 }
 0x1e1   :  { %571 = vpow2.f32 %v304_v37  ;;  %v280_v46 = vsub.f32 %v753_v5, %v261_v43 }
 0x1e2   :  { %v782_v47 = vpop.eup %561  ;;  %v310_v48 = vmul.f32 1.442695, %v281_v44 }
 0x1e3   :  { %v784_v49 = vpop.eup %563  ;;  %v251_v50 = vpop.xlane.xlu1 %250  ;;  %332 = vadd.xlane.f32.xlu0 %v782_v47  ;;  %v308_v53 = vmul.f32 1.442695, %v280_v46 }
 0x1e4   :  { %v249_v51 = vpop.xlane.xlu0 %248  ;;  %573 = vpow2.f32 %v310_v48  ;;  %322 = vadd.xlane.f32.xlu1 %v784_v49  ;;  %v275_v52 = vsub.f32 %v757_v6, %v251_v50  ;;  %v790_v55 = vpop.eup %565 }
 0x1e5   :  { %575 = vpow2.f32 %v292_v45  ;;  %v274_v54 = vsub.f32 %v760_v7, %v249_v51 }
 0x1e6   :  { %v298_v56 = vmul.f32 1.442695, %v275_v52  ;;  %v792_v57 = vpop.eup %567 }
 0x1e7   :  { %v267_v58 = vpop.xlane.xlu1 %266  ;;  %320 = vadd.xlane.f32.xlu0 %v792_v57  ;;  %v296_v61 = vmul.f32 1.442695, %v274_v54 }
 0x1e8   :  { %v265_v59 = vpop.xlane.xlu0 %264  ;;  %577 = vpow2.f32 %v298_v56  ;;  %338 = vadd.xlane.f32.xlu1 %v790_v55  ;;  %v283_v60 = vsub.f32 %v765_v8, %v267_v58 }
 0x1e9   :  { %579 = vpow2.f32 %v308_v53  ;;  %v282_v62 = vsub.f32 %v768_v9, %v265_v59 }
 0x1ea   :  { %v798_v63 = vpop.eup %569  ;;  %v314_v0 = vmul.f32 1.442695, %v283_v60 }
 0x1eb   :  { %v800_v1 = vpop.eup %571  ;;  %v312_v2 = vmul.f32 1.442695, %v282_v62 }
 0x1ec   :  { %581 = vpow2.f32 %v314_v0  ;;  %326 = vadd.xlane.f32.xlu1 %v798_v63  ;;  %336 = vadd.xlane.f32.xlu0 %v800_v1 }
 0x1ed   :  { %583 = vpow2.f32 %v296_v61 }
 0x1ee   :  { %v804_v3 = vpop.eup %573  ;;  %585 = vpow2.f32 %v312_v2 }
 0x1ef   :  { %v806_v4 = vpop.eup %575 }
 0x1f0   :  { %342 = vadd.xlane.f32.xlu1 %v804_v3  ;;  %324 = vadd.xlane.f32.xlu0 %v806_v4 }
 0x1f2   :  { %v810_v5 = vpop.eup %577 }
 0x1f3   :  { %v812_v6 = vpop.eup %579 }
 0x1f4   :  { %330 = vadd.xlane.f32.xlu1 %v810_v5  ;;  %340 = vadd.xlane.f32.xlu0 %v812_v6 }
 0x1f6   :  { %v816_v7 = vpop.eup %581 }
 0x1f7   :  { %v818_v8 = vpop.eup %583 }
 0x1f8   :  { %346 = vadd.xlane.f32.xlu1 %v816_v7  ;;  %328 = vadd.xlane.f32.xlu0 %v818_v8  ;;  %v822_v9 = vpop.eup %585 }
 0x1fc   :  { %344 = vadd.xlane.f32.xlu0 %v822_v9 }
 0x268   :  { %v319_v10 = vpop.xlane.xlu1 %318 }
 0x269   :  { %587 = vrcp.f32 %v319_v10 }
 0x26c   :  { %v317_v11 = vpop.xlane.xlu0 %316 }
 0x26d   :  { %v335_v12 = vpop.xlane.xlu1 %334  ;;  %589 = vrcp.f32 %v317_v11 }
 0x26e   :  { %591 = vrcp.f32 %v335_v12 }
 0x270   :  { %v333_v13 = vpop.xlane.xlu0 %332 }
 0x271   :  { %v323_v14 = vpop.xlane.xlu1 %322  ;;  %593 = vrcp.f32 %v333_v13 }
 0x272   :  { %595 = vrcp.f32 %v323_v14 }
 0x273   :  { %v588_v15 = vpop.eup %587 }
 0x274   :  { %v365_v16 = vmul.f32 %v588_v15, %v772_v33  ;;  %v321_v18 = vpop.xlane.xlu0 %320 }
 0x275   :  { %v339_v17 = vpop.xlane.xlu1 %338 }
 0x276   :  { %597 = vrcp.f32 %v339_v17  ;;  %381 = vst [vmem:[#allocation7 + $0x8] sm:$0xff] %v365_v16 }
 0x277   :  { %v590_v19 = vpop.eup %589  ;;  %599 = vrcp.f32 %v321_v18 }
 0x278   :  { %v592_v20 = vpop.eup %591  ;;  %v364_v21 = vmul.f32 %v590_v19, %v775_v39 }
 0x279   :  { %v373_v22 = vmul.f32 %v592_v20, %v777_v41  ;;  %v327_v23 = vpop.xlane.xlu1 %326  ;;  %v337_v24 = vpop.xlane.xlu0 %336 }
 0x27a   :  { %380 = vst [vmem:[#allocation7] sm:$0xff] %v364_v21  ;;  %601 = vrcp.f32 %v327_v23 }
 0x27b   :  { %v594_v25 = vpop.eup %593  ;;  %389 = vst [vmem:[#allocation7 + $0x48] sm:$0xff] %v373_v22  ;;  %603 = vrcp.f32 %v337_v24 }
 0x27c   :  { %v596_v26 = vpop.eup %595  ;;  %v372_v27 = vmul.f32 %v594_v25, %v782_v47 }
 0x27d   :  { %v367_v28 = vmul.f32 %v596_v26, %v784_v49  ;;  %v343_v29 = vpop.xlane.xlu1 %342  ;;  %v325_v30 = vpop.xlane.xlu0 %324 }
 0x27e   :  { %388 = vst [vmem:[#allocation7 + $0x40] sm:$0xff] %v372_v27  ;;  %605 = vrcp.f32 %v343_v29 }
 0x27f   :  { %383 = vst [vmem:[#allocation7 + $0x18] sm:$0xff] %v367_v28  ;;  %607 = vrcp.f32 %v325_v30 }
 0x280   :  { %v598_v31 = vpop.eup %597 }
 0x281   :  { %v600_v32 = vpop.eup %599  ;;  %v375_v33 = vmul.f32 %v598_v31, %v790_v55  ;;  %v331_v34 = vpop.xlane.xlu1 %330 }
 0x282   :  { %v341_v35 = vpop.xlane.xlu0 %340  ;;  %v366_v36 = vmul.f32 %v600_v32, %v792_v57  ;;  %609 = vrcp.f32 %v331_v34 }
 0x283   :  { %391 = vst [vmem:[#allocation7 + $0x58] sm:$0xff] %v375_v33  ;;  %611 = vrcp.f32 %v341_v35 }
 0x284   :  { %v602_v37 = vpop.eup %601  ;;  %382 = vst [vmem:[#allocation7 + $0x10] sm:$0xff] %v366_v36 }
 0x285   :  { %v604_v38 = vpop.eup %603  ;;  %v369_v39 = vmul.f32 %v602_v37, %v798_v63  ;;  %v347_v40 = vpop.xlane.xlu1 %346 }
 0x286   :  { %v329_v41 = vpop.xlane.xlu0 %328  ;;  %v374_v42 = vmul.f32 %v604_v38, %v800_v1  ;;  %613 = vrcp.f32 %v347_v40 }
 0x287   :  { %385 = vst [vmem:[#allocation7 + $0x28] sm:$0xff] %v369_v39  ;;  %615 = vrcp.f32 %v329_v41 }
 0x288   :  { %v606_v43 = vpop.eup %605  ;;  %390 = vst [vmem:[#allocation7 + $0x50] sm:$0xff] %v374_v42 }
 0x289   :  { %v608_v44 = vpop.eup %607  ;;  %v377_v45 = vmul.f32 %v606_v43, %v804_v3 }
 0x28a   :  { %v345_v46 = vpop.xlane.xlu0 %344  ;;  %v368_v47 = vmul.f32 %v608_v44, %v806_v4 }
 0x28b   :  { %617 = vrcp.f32 %v345_v46  ;;  %393 = vst [vmem:[#allocation7 + $0x68] sm:$0xff] %v377_v45 }
 0x28c   :  { %v610_v48 = vpop.eup %609  ;;  %384 = vst [vmem:[#allocation7 + $0x20] sm:$0xff] %v368_v47 }
 0x28d   :  { %v612_v49 = vpop.eup %611  ;;  %v371_v50 = vmul.f32 %v610_v48, %v810_v5 }
 0x28e   :  { %v376_v51 = vmul.f32 %v612_v49, %v812_v6 }
 0x28f   :  { %387 = vst [vmem:[#allocation7 + $0x38] sm:$0xff] %v371_v50 }
 0x290   :  { %v614_v52 = vpop.eup %613  ;;  %392 = vst [vmem:[#allocation7 + $0x60] sm:$0xff] %v376_v51 }
 0x291   :  { %v616_v53 = vpop.eup %615  ;;  %v379_v54 = vmul.f32 %v614_v52, %v816_v7 }
 0x292   :  { %v370_v55 = vmul.f32 %v616_v53, %v818_v8 }
 0x293   :  { %395 = vst [vmem:[#allocation7 + $0x78] sm:$0xff] %v379_v54 }
 0x294   :  { %386 = vst [vmem:[#allocation7 + $0x30] sm:$0xff] %v370_v55 }
 0x295   :  { %v618_v56 = vpop.eup %617 }
 0x296   :  { %v378_v57 = vmul.f32 %v618_v56, %v822_v9 }
 0x298   :  { %394 = vst [vmem:[#allocation7 + $0x70] sm:$0xff] %v378_v57 }
 0x299   :  { %674 = shalt.err (!%p671_p6)
}
 0x29a   :  { %s675_s10 = scalar_lea.hbm %s858_s2, 2048 }
 0x29b   :  { %p676_p7 = scmp.ne.s32.totalorder %s858_s2, %s675_s10  ;;  %p679_p8 = scmp.lt.u32.totalorder %s675_s10, %s858_s2 }
 0x29d   :  { %p681_p9 = pnand %p679_p8, %p676_p7 }
 0x29f   :  { %684 = shalt.err (!%p681_p9)
}
 0x2a0   :  { %407 = dma.vmem_to_hbm [thread:$0]  %s402_s6, 2048, %s858_s2, [#allocation4], %s692_s19, %s692_s19, %s693_s20  }
 0x2a1   :  { %689 = dma.done.wait [#allocation4], 2048  }
 0x2a2   :  { %690 = vsyncadd [#allocation4], 4294965248 }
 0x2a3   :  { %411 = vsyncpa [#allocation3], 1 }
 0x2a4   :  { %412 = vsyncpa [#allocation6], 1 }
 0x2a5   :  { %413 = vsyncpa [#allocation4], 1 }

</bundles_post_ra>
